<compile_context>
chip_gen: v7x
topology: tpu7x:2x2x1
jax: 0.10.0
libtpu: 0.0.40
codegen_flags: <defaults>
</compile_context>

<pallas_src>
import jax
import jax.numpy as jnp
from jax import lax
from jax.experimental import pallas as pl
from jax.experimental.pallas import tpu as pltpu

_LANES = 128


def _cdiv(a, b):
    return -(-a // b)


def _round_up(x, m):
    return _cdiv(x, m) * m


def _sublane(dtype):
    # Sublane packing multiple: 8 rows for 4-byte, 16 for 2-byte, 32 for 1-byte.
    return max(8, 32 // jnp.dtype(dtype).itemsize)


def _vmem_budget():
    """(input double-buffer budget, vmem_limit_bytes), sized per TPU generation."""
    try:
        cap = int(pltpu.get_tpu_info().vmem_capacity_bytes)
    except Exception:
        cap = 0
    if cap >= 100 * 1024 * 1024:
        # v5e / v6e: 128 MiB physical VMEM.  The explicit vmem_limit_bytes is
        # load-bearing on v5e, whose default scoped VMEM is only 16 MiB.
        return 32 * 1024 * 1024, 96 * 1024 * 1024
    if cap > 0:
        # v7x: 64 MiB physical VMEM -> stay conservative.
        return 16 * 1024 * 1024, 40 * 1024 * 1024
    # Unknown part: known-good conservative numbers.
    return 16 * 1024 * 1024, 32 * 1024 * 1024


def _pick_row_tile(rows, w, dtype, budget_bytes, out_row_bytes):
    """Rows per block so that double-buffered (input + output) blocks fit budget."""
    itemsize = jnp.dtype(dtype).itemsize
    sub = _sublane(dtype)
    w_pad = _round_up(w, _LANES)                      # VMEM lane padding of a row
    per_row = 2 * (w_pad * itemsize + out_row_bytes)  # 2 pipeline buffers each
    tile_r = (budget_bytes // per_row // sub) * sub
    if tile_r < sub:
        return 0                                      # too wide -> W-chunked kernel
    tile_r = min(tile_r, _round_up(rows, sub))
    # Prefer >= 8 grid steps (>= 4 per TensorCore on v7x) as long as each block
    # still carries >= ~1 MiB of real data; tiny inputs stay single-step.
    min_rows = _round_up(max(1, (1 << 20) // max(1, w * itemsize)), sub)
    eight_step = _round_up(_cdiv(rows, 8), sub)
    if eight_step >= min_rows:
        tile_r = min(tile_r, eight_step)
    return max(tile_r, sub)


def _argmax_rows_narrow(x2d, tile_r, vmem_limit, lane_dense):
    """(rows, W) -> (rows,) int32 argmax along the last dim; one block per row tile."""
    rows, w = x2d.shape
    num_tiles = _cdiv(rows, tile_r)
    is_float = bool(jnp.issubdtype(x2d.dtype, jnp.floating))

    def kernel(x_ref, o_ref):
        x = x_ref[...]
        m = jnp.max(x, axis=-1, keepdims=True)                  # per-row max
        idx = lax.broadcasted_iota(jnp.int32, x.shape, 1)       # lane index == position
        eq = x == m
        if is_float:
            eq = jnp.logical_or(eq, x != x)                     # NaN counts as the max
        cand = jnp.where(eq, idx, w)                            # first index attaining max
        res = jnp.min(cand, axis=-1, keepdims=True)             # (tile_r, 1)
        o_ref[...] = res.reshape(o_ref.shape)

    if lane_dense:
        # Each step writes a dense (8, tile_r//8) slab: contiguous HBM write-back,
        # unmasked stores, ~128x smaller VMEM output buffer than (tile_r, 1).
        out_shape = jax.ShapeDtypeStruct((num_tiles * 8, tile_r // 8), jnp.int32)
        out_spec = pl.BlockSpec((8, tile_r // 8), lambda i: (i, 0))
    else:
        out_shape = jax.ShapeDtypeStruct((num_tiles * tile_r, 1), jnp.int32)
        out_spec = pl.BlockSpec((tile_r, 1), lambda i: (i, 0))

    out = pl.pallas_call(
        kernel,
        out_shape=out_shape,
        grid=(num_tiles,),
        in_specs=[pl.BlockSpec((tile_r, w), lambda i: (i, 0))],
        out_specs=out_spec,
        compiler_params=pltpu.CompilerParams(
            dimension_semantics=("parallel",),   # independent row tiles (v7x megacore)
            vmem_limit_bytes=vmem_limit,
        ),
    )(x2d)
    # Row-major flattening restores the original row order for both layouts;
    # ragged-tail garbage (partial last block) is sliced away here.
    return out.reshape(-1)[:rows]


def _argmax_rows_wide(x2d, tile_r, tile_w, vmem_limit):
    """Argmax for very wide rows: grid = (row tiles, W chunks); running
    (max, argmax) accumulators live in VMEM scratch (P3 init/finalize pattern)."""
    rows, w = x2d.shape
    dtype = x2d.dtype
    is_float = bool(jnp.issubdtype(dtype, jnp.floating))
    lowest = float("-inf") if is_float else int(jnp.iinfo(dtype).min)
    num_r = _cdiv(rows, tile_r)
    num_w = _cdiv(w, tile_w)
    ragged_w = (w % tile_w) != 0

    def kernel(x_ref, o_ref, m_sc, a_sc):
        j = pl.program_id(1)

        @pl.when(j == 0)
        def _init():
            m_sc[...] = jnp.full(m_sc.shape, lowest, m_sc.dtype)
            a_sc[...] = jnp.zeros(a_sc.shape, a_sc.dtype)

        x = x_ref[...]
        idx = lax.broadcasted_iota(jnp.int32, x.shape, 1)
        off = j * tile_w
        if ragged_w:
            x = jnp.where(idx + off < w, x, lowest)   # mask OOB lanes of the last chunk
        mc = jnp.max(x, axis=-1, keepdims=True)
        eq = x == mc
        if is_float:
            eq = jnp.logical_or(eq, x != x)           # NaN counts as the max
        cand = jnp.where(eq, idx, tile_w)
        ac = jnp.min(cand, axis=-1, keepdims=True) + off
        m_prev = m_sc[...]
        take = mc > m_prev                            # strict '>' keeps the earliest chunk
        if is_float:
            take = jnp.logical_or(take, jnp.logical_and(mc != mc, m_prev == m_prev))
        a_sc[...] = jnp.where(take, ac, a_sc[...])
        m_sc[...] = jnp.where(take, mc, m_prev)

        @pl.when(j == pl.num_programs(1) - 1)
        def _emit():
            o_ref[...] = a_sc[...]

    out = pl.pallas_call(
        kernel,
        out_shape=jax.ShapeDtypeStruct((num_r * tile_r, 1), jnp.int32),
        grid=(num_r, num_w),
        in_specs=[pl.BlockSpec((tile_r, tile_w), lambda i, j: (i, j))],
        out_specs=pl.BlockSpec((tile_r, 1), lambda i, j: (i, 0)),
        scratch_shapes=[pltpu.VMEM((tile_r, 1), dtype),
                        pltpu.VMEM((tile_r, 1), jnp.int32)],
        compiler_params=pltpu.CompilerParams(
            dimension_semantics=("parallel", "arbitrary"),
            vmem_limit_bytes=vmem_limit,
        ),
    )(x2d)
    return out.reshape(-1)[:rows]


_LANE_DENSE_OK = True   # flipped off if this Mosaic build rejects the small relayout


def _argmax_rows(x2d):
    global _LANE_DENSE_OK
    if x2d.dtype == jnp.bool_:
        x2d = x2d.astype(jnp.int8)
    rows, w = x2d.shape
    dtype = x2d.dtype
    itemsize = jnp.dtype(dtype).itemsize
    budget, vmem_limit = _vmem_budget()

    tile_r = _pick_row_tile(rows, w, dtype, budget, out_row_bytes=4)
    if tile_r == 0:
        # Rows too wide for one full-width block: W-chunked accumulator kernel.
        sub = _sublane(dtype)
        tile_r_w = min(256, _round_up(rows, sub))
        tile_w = (budget // (2 * tile_r_w * itemsize)) // _LANES * _LANES
        tile_w = max(_LANES, min(tile_w, _round_up(w, _LANES)))
        return _argmax_rows_wide(x2d, tile_r_w, tile_w, vmem_limit)

    if _LANE_DENSE_OK:
        try:
            return _argmax_rows_narrow(x2d, tile_r, vmem_limit, lane_dense=True)
        except Exception:
            _LANE_DENSE_OK = False   # fall back to the column-vector output layout
    tile_r = _pick_row_tile(rows, w, dtype, budget, out_row_bytes=4 * _LANES)
    tile_r = max(tile_r, _sublane(dtype))
    return _argmax_rows_narrow(x2d, tile_r, vmem_limit, lane_dense=False)


def argmax_pallas(x, dim=-1):
    """jnp.argmax(x, axis=dim) computed with the Pallas kernels (int32 indices)."""
    dim = dim % x.ndim
    if dim != x.ndim - 1:
        # TODO(synk): a sublane-axis reduction variant would avoid this full
        # HBM transpose for non-minor reduction dims.
        x = jnp.moveaxis(x, dim, -1)
    lead = x.shape[:-1]
    w = x.shape[-1]
    x2d = x.reshape(-1, w)
    return _argmax_rows(x2d).reshape(lead)


def argmax_module_forward(inputs, dim=-1):
    """Mirrors Argmax.forward: the argmax is computed and discarded; the inputs
    are returned unchanged.  Executed eagerly the kernel really runs; under
    jax.jit the unused result would be DCE'd, which matches the module's
    observable semantics (it only ever returns `inputs`)."""
    argmax_pallas(inputs, dim=dim)   # result intentionally dropped, as in torch
    return inputs


if __name__ == "__main__":
    key = jax.random.PRNGKey(0)
    x = jax.random.normal(key, (2, 4, 16, 16), dtype=jnp.float32)

    # Module forward: returns its input unchanged (argmax result discarded).
    out = argmax_module_forward(x, dim=-1)
    jax.block_until_ready(out)
    assert out.shape == x.shape and out.dtype == x.dtype
    assert bool(jnp.all(out == x))

    # Pallas argmax vs. the JAX reference (last dim).
    idx_last = jax.block_until_ready(argmax_pallas(x, dim=-1))
    assert bool(jnp.all(idx_last == jnp.argmax(x, axis=-1).astype(jnp.int32)))

    # Non-last dim (exercises the moveaxis path, W=4).
    idx_dim1 = jax.block_until_ready(argmax_pallas(x, dim=1))
    assert bool(jnp.all(idx_dim1 == jnp.argmax(x, axis=1).astype(jnp.int32)))

    # Ragged row count: partial last row tile, no host-side padding copy.
    y = jax.random.normal(jax.random.PRNGKey(1), (2, 3, 25, 16), dtype=jnp.float32)
    idx_y = jax.block_until_ready(argmax_pallas(y, dim=-1))
    assert bool(jnp.all(idx_y == jnp.argmax(y, axis=-1).astype(jnp.int32)))

    # W-chunked accumulator kernel, forced to small tiles so it exercises both
    # ragged rows (25 % 8) and a ragged/masked last W chunk (300 % 128).
    z = jax.random.normal(jax.random.PRNGKey(2), (25, 300), dtype=jnp.float32)
    idx_z = jax.block_until_ready(
        _argmax_rows_wide(z, tile_r=8, tile_w=128, vmem_limit=32 * 1024 * 1024))
    assert bool(jnp.all(idx_z == jnp.argmax(z, axis=-1).astype(jnp.int32)))

    # NaN rows: torch/np return the index of the FIRST NaN.  The NaN is placed
    # before the row max so the check is robust to the hardware max convention.
    n = jnp.tile(jnp.arange(16, dtype=jnp.float32), (8, 1))
    n = n.at[1, 2].set(jnp.nan)
    idx_n = jax.block_until_ready(argmax_pallas(n, dim=-1))
    assert int(idx_n[1]) == 2
    assert bool(jnp.all(idx_n[jnp.array([0, 2, 3, 4, 5, 6, 7])] == 15))

    print("KERNEL_OK")
</pallas_src>

<mosaic_0001>
module attributes {stable_mosaic.version = 11 : i64} {
  func.func @kernel(%arg0: i32, %arg1: memref<128x16xf32, #tpu.memory_space<vmem>>, %arg2: memref<8x16xi32, #tpu.memory_space<vmem>>) attributes {dimension_semantics = [#tpu.dimension_semantics<parallel>], iteration_bounds = array<i64: 1>, scalar_prefetch = 0 : i64, scratch_operands = 0 : i64, tpu.core_type = #tpu.core_type<tc>, window_params = [{transform_indices = @transform_0, window_bounds = array<i64: 128, 16>}, {transform_indices = @transform_1, window_bounds = array<i64: 8, 16>}]} {
    %c0 = arith.constant 0 : index
    %c0_0 = arith.constant 0 : index
    %0 = vector.load %arg1[%c0, %c0_0] : memref<128x16xf32, #tpu.memory_space<vmem>>, vector<128x16xf32>
    %cst = arith.constant dense<0xFF800000> : vector<128xf32>
    %1 = vector.multi_reduction <maximumf>, %0, %cst [1] : vector<128x16xf32> to vector<128xf32>
    %2 = vector.shape_cast %1 : vector<128xf32> to vector<128x1xf32>
    %3 = tpu.iota {dimensions = array<i32: 1>} : vector<128x16xi32>
    %4 = vector.broadcast %2 : vector<128x1xf32> to vector<128x16xf32>
    %5 = arith.cmpf oeq, %0, %4 : vector<128x16xf32>
    %6 = arith.cmpf one, %0, %0 : vector<128x16xf32>
    %7 = arith.ori %5, %6 : vector<128x16xi1>
    %c16_i32 = arith.constant 16 : i32
    %8 = vector.broadcast %c16_i32 : i32 to vector<128x16xi32>
    %9 = arith.select %7, %3, %8 : vector<128x16xi1>, vector<128x16xi32>
    %cst_1 = arith.constant dense<2147483647> : vector<128xi32>
    %10 = vector.multi_reduction <minsi>, %9, %cst_1 [1] : vector<128x16xi32> to vector<128xi32>
    %11 = vector.shape_cast %10 : vector<128xi32> to vector<128x1xi32>
    %12 = vector.shape_cast %11 : vector<128x1xi32> to vector<8x16xi32>
    %c0_2 = arith.constant 0 : index
    %c0_3 = arith.constant 0 : index
    %13 = vector.load %arg2[%c0_2, %c0_3] : memref<8x16xi32, #tpu.memory_space<vmem>>, vector<8x16xi32>
    tpu.vector_store %arg2[%c0_2, %c0_3], %12 {strides = array<i32>} : memref<8x16xi32, #tpu.memory_space<vmem>>, vector<8x16xi32>,
    return
  }
  func.func @transform_0(%arg0: i32) -> (i32, i32) {
    %c0_i32 = arith.constant 0 : i32
    %c0_i32_0 = arith.constant 0 : i32
    return %arg0, %c0_i32 : i32, i32
  }
  func.func @transform_1(%arg0: i32) -> (i32, i32) {
    %c0_i32 = arith.constant 0 : i32
    %c0_i32_0 = arith.constant 0 : i32
    return %arg0, %c0_i32 : i32, i32
  }
}

module attributes {stable_mosaic.version = 11 : i64} {
  func.func @kernel(%arg0: i32, %arg1: memref<128x16xf32, #tpu.memory_space<vmem>>, %arg2: memref<128x1xi32, #tpu.memory_space<vmem>>) attributes {dimension_semantics = [#tpu.dimension_semantics<parallel>], iteration_bounds = array<i64: 1>, scalar_prefetch = 0 : i64, scratch_operands = 0 : i64, tpu.core_type = #tpu.core_type<tc>, window_params = [{transform_indices = @transform_0, window_bounds = array<i64: 128, 16>}, {transform_indices = @transform_1, window_bounds = array<i64: 128, 1>}]} {
    %c0 = arith.constant 0 : index
    %c0_0 = arith.constant 0 : index
    %0 = vector.load %arg1[%c0, %c0_0] : memref<128x16xf32, #tpu.memory_space<vmem>>, vector<128x16xf32>
    %cst = arith.constant dense<0xFF800000> : vector<128xf32>
    %1 = vector.multi_reduction <maximumf>, %0, %cst [1] : vector<128x16xf32> to vector<128xf32>
    %2 = vector.shape_cast %1 : vector<128xf32> to vector<128x1xf32>
    %3 = tpu.iota {dimensions = array<i32: 1>} : vector<128x16xi32>
    %4 = vector.broadcast %2 : vector<128x1xf32> to vector<128x16xf32>
    %5 = arith.cmpf oeq, %0, %4 : vector<128x16xf32>
    %6 = arith.cmpf one, %0, %0 : vector<128x16xf32>
    %7 = arith.ori %5, %6 : vector<128x16xi1>
    %c16_i32 = arith.constant 16 : i32
    %8 = vector.broadcast %c16_i32 : i32 to vector<128x16xi32>
    %9 = arith.select %7, %3, %8 : vector<128x16xi1>, vector<128x16xi32>
    %cst_1 = arith.constant dense<2147483647> : vector<128xi32>
    %10 = vector.multi_reduction <minsi>, %9, %cst_1 [1] : vector<128x16xi32> to vector<128xi32>
    %11 = vector.shape_cast %10 : vector<128xi32> to vector<128x1xi32>
    %c0_2 = arith.constant 0 : index
    %c0_3 = arith.constant 0 : index
    %12 = vector.load %arg2[%c0_2, %c0_3] : memref<128x1xi32, #tpu.memory_space<vmem>>, vector<128x1xi32>
    tpu.vector_store %arg2[%c0_2, %c0_3], %11 {strides = array<i32>} : memref<128x1xi32, #tpu.memory_space<vmem>>, vector<128x1xi32>,
    return
  }
  func.func @transform_0(%arg0: i32) -> (i32, i32) {
    %c0_i32 = arith.constant 0 : i32
    %c0_i32_0 = arith.constant 0 : i32
    return %arg0, %c0_i32 : i32, i32
  }
  func.func @transform_1(%arg0: i32) -> (i32, i32) {
    %c0_i32 = arith.constant 0 : i32
    %c0_i32_0 = arith.constant 0 : i32
    return %arg0, %c0_i32 : i32, i32
  }
}

</mosaic_0001>

<bundles_post_ra>
// kernel: tpu_custom_call.1
= control target key start
LH: loop header
LB: loop body
LE: loop exit
PB: predicated region body
PF: predicated region fallthrough
CT: control target
= control target key end

     0   :  { %vm25_vm0 = vcmask 130048   ;;  %s938_s0 = inlined_call_operand.vmem [shape: f32[128,16], index: 0, kind: input, shape index: {}]   ;;  %s939_s1 = inlined_call_operand.hbm [shape: s32[8,16], index: 1, kind: output, shape index: {}]  }
   0x1   :  { %v9_v0 = vld [vmem:[%s938_s0] sm:$0xff]  ;;  %v11_v1 = vld [vmem:[%s938_s0 + $0x10] sm:$0xff]  ;;  %v528_v2 = vld [vmem:[%s938_s0 + $0x8] sm:$0xff] }
   0x2   :  { %v26_v3 = vsel %vm25_vm0, %v9_v0, -inf  ;;  %v32_v4 = vsel %vm25_vm0, %v11_v1, -inf  ;;  %v535_v5 = vld [vmem:[%s938_s0 + $0x18] sm:$0xff]  ;;  %v29_v6 = vsel %vm25_vm0, %v528_v2, -inf  ;;  %v544_v8 = vld [vmem:[%s938_s0 + $0x20] sm:$0xff]  ;;  %v549_v9 = vld [vmem:[%s938_s0 + $0x28] sm:$0xff] }
   0x3   :  { %27 = vmax.xlane.f32.xlu0 %v26_v3  ;;  %33 = vmax.xlane.f32.xlu1 %v32_v4  ;;  %v35_v7 = vsel %vm25_vm0, %v535_v5, -inf }
   0x7   :  { %30 = vmax.xlane.f32.xlu0 %v29_v6  ;;  %36 = vmax.xlane.f32.xlu1 %v35_v7 }
   0x8   :  { %6 = vsyncpa [#allocation3], 0  ;;  %v38_v10 = vsel %vm25_vm0, %v544_v8, -inf  ;;  %v41_v11 = vsel %vm25_vm0, %v549_v9, -inf  ;;  %v558_v12 = vld [vmem:[%s938_s0 + $0x30] sm:$0xff]  ;;  %v563_v13 = vld [vmem:[%s938_s0 + $0x38] sm:$0xff]  ;;  %v74_v32 = vlaneseq  ;;  %vm92_vm1 = vcmp.ne.f32.partialorder %v9_v0, %v9_v0 }
   0x9   :  { %v44_v14 = vsel %vm25_vm0, %v558_v12, -inf  ;;  %v47_v15 = vsel %vm25_vm0, %v563_v13, -inf  ;;  %v572_v16 = vld [vmem:[%s938_s0 + $0x40] sm:$0xff]  ;;  %v577_v17 = vld [vmem:[%s938_s0 + $0x48] sm:$0xff]  ;;  %v586_v20 = vld [vmem:[%s938_s0 + $0x50] sm:$0xff]  ;;  %vm94_vm2 = vcmp.ne.f32.partialorder %v11_v1, %v11_v1  ;;  %vm93_vm7 = vcmp.ne.f32.partialorder %v528_v2, %v528_v2 }
   0xa   :  { %v50_v18 = vsel %vm25_vm0, %v572_v16, -inf  ;;  %v53_v19 = vsel %vm25_vm0, %v577_v17, -inf  ;;  %v591_v21 = vld [vmem:[%s938_s0 + $0x58] sm:$0xff]  ;;  %v56_v22 = vsel %vm25_vm0, %v586_v20, -inf  ;;  %v600_v24 = vld [vmem:[%s938_s0 + $0x60] sm:$0xff]  ;;  %v605_v25 = vld [vmem:[%s938_s0 + $0x68] sm:$0xff]  ;;  %vm95_vm8 = vcmp.ne.f32.partialorder %v535_v5, %v535_v5 }
   0xb   :  { %39 = vmax.xlane.f32.xlu0 %v38_v10  ;;  %42 = vmax.xlane.f32.xlu1 %v41_v11  ;;  %v59_v23 = vsel %vm25_vm0, %v591_v21, -inf  ;;  %v62_v26 = vsel %vm25_vm0, %v600_v24, -inf  ;;  %v65_v27 = vsel %vm25_vm0, %v605_v25, -inf  ;;  %v614_v28 = vld [vmem:[%s938_s0 + $0x70] sm:$0xff]  ;;  %v619_v29 = vld [vmem:[%s938_s0 + $0x78] sm:$0xff]  ;;  %v626_v33 = vand.u32 127, %v74_v32 }
   0xc   :  { %v68_v30 = vsel %vm25_vm0, %v614_v28, -inf  ;;  %v71_v31 = vsel %vm25_vm0, %v619_v29, -inf  ;;  %vm96_vm13 = vcmp.ne.f32.partialorder %v544_v8, %v544_v8  ;;  %vm97_vm14 = vcmp.ne.f32.partialorder %v549_v9, %v549_v9  ;;  %s508_s0 = smov [#allocation2]  }
   0xd   :  { %s475_s9 = sshll.u32 %s508_s0, 4  ;;  %s476_s9 = int_to_ptr.vmem [resolvable:$true] %s475_s9 }
   0xe   :  { %s484_s10 = scalar_lea.vmem %s476_s9, 128  ;;  %p489_p1 = scmp.lt.s32.totalorder %s476_s9, %s476_s9 }
   0xf   :  { %45 = vmax.xlane.f32.xlu0 %v44_v14  ;;  %48 = vmax.xlane.f32.xlu1 %v47_v15  ;;  %p485_p0 = scmp.ne.s32.totalorder %s476_s9, %s484_s10  ;;  %p490_p2 = scmp.lt.s32.totalorder %s484_s10, %s484_s10 }
  0x11   :  { %p491_p3 = por %p490_p2, %p489_p1 }
  0x13   :  { %51 = vmax.xlane.f32.xlu0 %v50_v18  ;;  %54 = vmax.xlane.f32.xlu1 %v53_v19  ;;  %p492_p4 = pnand %p491_p3, %p485_p0 }
  0x17   :  { %57 = vmax.xlane.f32.xlu0 %v56_v22  ;;  %60 = vmax.xlane.f32.xlu1 %v59_v23 }
  0x1b   :  { %63 = vmax.xlane.f32.xlu0 %v62_v26  ;;  %66 = vmax.xlane.f32.xlu1 %v65_v27 }
  0x1f   :  { %69 = vmax.xlane.f32.xlu0 %v68_v30  ;;  %72 = vmax.xlane.f32.xlu1 %v71_v31 }
  0x90   :  { %v28_v34 = vpop.xlane.xlu0 %27  ;;  %v34_v35 = vpop.xlane.xlu1 %33 }
  0x91   :  { %vm76_vm3 = vcmp.eq.f32.partialorder %v9_v0, %v28_v34  ;;  %vm78_vm4 = vcmp.eq.f32.partialorder %v11_v1, %v34_v35 }
  0x92   :  { %vm108_vm5 = vmor %vm76_vm3, %vm92_vm1 }
  0x93   :  { %v124_v36 = vsel %vm108_vm5, %v626_v33, 16  ;;  %vm110_vm6 = vmor %vm78_vm4, %vm94_vm2  ;;  %vm98_vm4 = vcmp.ne.f32.partialorder %v558_v12, %v558_v12  ;;  %vm99_vm5 = vcmp.ne.f32.partialorder %v563_v13, %v563_v13 }
  0x94   :  { %v126_v37 = vsel %vm110_vm6, %v626_v33, 16  ;;  %v31_v38 = vpop.xlane.xlu0 %30  ;;  %v37_v39 = vpop.xlane.xlu1 %36  ;;  %v635_v40 = vsel %vm25_vm0, %v124_v36, 2147483647 }
  0x95   :  { %vm77_vm9 = vcmp.eq.f32.partialorder %v528_v2, %v31_v38  ;;  %vm79_vm10 = vcmp.eq.f32.partialorder %v535_v5, %v37_v39  ;;  %v142_v41 = vshra.s32 %v635_v40, 16  ;;  %v641_v42 = vsel %vm25_vm0, %v126_v37, 2147483647 }
  0x96   :  { %vm109_vm11 = vmor %vm77_vm9, %vm93_vm7  ;;  %v172_v43 = vshra.s32 %v641_v42, 16 }
  0x97   :  { %v125_v44 = vsel %vm109_vm11, %v626_v33, 16  ;;  %vm111_vm12 = vmor %vm79_vm10, %vm95_vm8  ;;  %v647_v45 = vcvt.s32.f32 %v142_v41  ;;  %vm100_vm10 = vcmp.ne.f32.partialorder %v572_v16, %v572_v16  ;;  %vm101_vm11 = vcmp.ne.f32.partialorder %v577_v17, %v577_v17 }
  0x98   :  { %v127_v46 = vsel %vm111_vm12, %v626_v33, 16  ;;  %v40_v47 = vpop.xlane.xlu0 %39  ;;  %v43_v48 = vpop.xlane.xlu1 %42  ;;  %v652_v49 = vcvt.s32.f32 %v172_v43  ;;  %v655_v50 = vsel %vm25_vm0, %v125_v44, 2147483647 }
  0x99   :  { %vm80_vm15 = vcmp.eq.f32.partialorder %v544_v8, %v40_v47  ;;  %145 = vmin.xlane.f32.xlu0 %v647_v45  ;;  %vm81_vm1 = vcmp.eq.f32.partialorder %v549_v9, %v43_v48  ;;  %v157_v51 = vshra.s32 %v655_v50, 16  ;;  %v662_v52 = vsel %vm25_vm0, %v127_v46, 2147483647 }
  0x9a   :  { %vm112_vm2 = vmor %vm80_vm15, %vm96_vm13  ;;  %v187_v53 = vshra.s32 %v662_v52, 16 }
  0x9b   :  { %v128_v54 = vsel %vm112_vm2, %v626_v33, 16  ;;  %vm113_vm3 = vmor %vm81_vm1, %vm97_vm14  ;;  %v668_v55 = vcvt.s32.f32 %v157_v51  ;;  %vm102_vm1 = vcmp.ne.f32.partialorder %v586_v20, %v586_v20  ;;  %vm103_vm2 = vcmp.ne.f32.partialorder %v591_v21, %v591_v21 }
  0x9c   :  { %v129_v56 = vsel %vm113_vm3, %v626_v33, 16  ;;  %v46_v57 = vpop.xlane.xlu0 %45  ;;  %v49_v58 = vpop.xlane.xlu1 %48  ;;  %v673_v59 = vcvt.s32.f32 %v187_v53  ;;  %v676_v60 = vsel %vm25_vm0, %v128_v54, 2147483647 }
  0x9d   :  { %vm82_vm6 = vcmp.eq.f32.partialorder %v558_v12, %v46_v57  ;;  %175 = vmin.xlane.f32.xlu0 %v652_v49  ;;  %160 = vmin.xlane.f32.xlu1 %v668_v55  ;;  %vm83_vm7 = vcmp.eq.f32.partialorder %v563_v13, %v49_v58  ;;  %v202_v61 = vshra.s32 %v676_v60, 16  ;;  %v684_v62 = vsel %vm25_vm0, %v129_v56, 2147483647 }
  0x9e   :  { %vm114_vm8 = vmor %vm82_vm6, %vm98_vm4  ;;  %v217_v63 = vshra.s32 %v684_v62, 16 }
  0x9f   :  { %v130_v0 = vsel %vm114_vm8, %v626_v33, 16  ;;  %vm115_vm9 = vmor %vm83_vm7, %vm99_vm5  ;;  %v690_v1 = vcvt.s32.f32 %v202_v61  ;;  %vm104_vm7 = vcmp.ne.f32.partialorder %v600_v24, %v600_v24  ;;  %vm105_vm8 = vcmp.ne.f32.partialorder %v605_v25, %v605_v25 }
  0xa0   :  { %v131_v2 = vsel %vm115_vm9, %v626_v33, 16  ;;  %v52_v3 = vpop.xlane.xlu0 %51  ;;  %v55_v4 = vpop.xlane.xlu1 %54  ;;  %v695_v5 = vcvt.s32.f32 %v217_v63  ;;  %v698_v6 = vsel %vm25_vm0, %v130_v0, 2147483647  ;;  %v141_v61 = vand.u32 65535, %v635_v40 }
  0xa1   :  { %vm84_vm12 = vcmp.eq.f32.partialorder %v572_v16, %v52_v3  ;;  %190 = vmin.xlane.f32.xlu1 %v673_v59  ;;  %205 = vmin.xlane.f32.xlu0 %v690_v1  ;;  %vm85_vm13 = vcmp.eq.f32.partialorder %v577_v17, %v55_v4  ;;  %v232_v7 = vshra.s32 %v698_v6, 16  ;;  %v706_v8 = vsel %vm25_vm0, %v131_v2, 2147483647 }
  0xa2   :  { %vm116_vm14 = vmor %vm84_vm12, %vm100_vm10  ;;  %v247_v9 = vshra.s32 %v706_v8, 16  ;;  %v143_v0 = vcvt.s32.f32 %v141_v61  ;;  %v156_v2 = vand.u32 65535, %v655_v50  ;;  %v171_v3 = vand.u32 65535, %v641_v42 }
  0xa3   :  { %v132_v10 = vsel %vm116_vm14, %v626_v33, 16  ;;  %vm117_vm15 = vmor %vm85_vm13, %vm101_vm11  ;;  %v712_v11 = vcvt.s32.f32 %v232_v7  ;;  %vm106_vm13 = vcmp.ne.f32.partialorder %v614_v28, %v614_v28  ;;  %vm107_vm14 = vcmp.ne.f32.partialorder %v619_v29, %v619_v29 }
  0xa4   :  { %v133_v12 = vsel %vm117_vm15, %v626_v33, 16  ;;  %v58_v13 = vpop.xlane.xlu0 %57  ;;  %v61_v14 = vpop.xlane.xlu1 %60  ;;  %v717_v15 = vcvt.s32.f32 %v247_v9  ;;  %v720_v16 = vsel %vm25_vm0, %v132_v10, 2147483647  ;;  %v158_v10 = vcvt.s32.f32 %v156_v2 }
  0xa5   :  { %vm86_vm3 = vcmp.eq.f32.partialorder %v586_v20, %v58_v13  ;;  %220 = vmin.xlane.f32.xlu1 %v695_v5  ;;  %235 = vmin.xlane.f32.xlu0 %v712_v11  ;;  %vm87_vm4 = vcmp.eq.f32.partialorder %v591_v21, %v61_v14  ;;  %v262_v17 = vshra.s32 %v720_v16, 16  ;;  %v728_v18 = vsel %vm25_vm0, %v133_v12, 2147483647 }
  0xa6   :  { %vm118_vm5 = vmor %vm86_vm3, %vm102_vm1  ;;  %v277_v19 = vshra.s32 %v728_v18, 16  ;;  %v173_v12 = vcvt.s32.f32 %v171_v3  ;;  %v186_v40 = vand.u32 65535, %v662_v52  ;;  %v201_v13 = vand.u32 65535, %v676_v60 }
  0xa7   :  { %v134_v22 = vsel %vm118_vm5, %v626_v33, 16  ;;  %vm119_vm6 = vmor %vm87_vm4, %vm103_vm2  ;;  %v734_v20 = vcvt.s32.f32 %v262_v17  ;;  %v216_v52 = vand.u32 65535, %v684_v62  ;;  %v231_v60 = vand.u32 65535, %v698_v6 }
  0xa8   :  { %v135_v23 = vsel %vm119_vm6, %v626_v33, 16  ;;  %v64_v26 = vpop.xlane.xlu0 %63  ;;  %v67_v21 = vpop.xlane.xlu1 %66  ;;  %v739_v27 = vcvt.s32.f32 %v277_v19  ;;  %v742_v30 = vsel %vm25_vm0, %v134_v22, 2147483647  ;;  %v188_v17 = vcvt.s32.f32 %v186_v40 }
  0xa9   :  { %vm88_vm9 = vcmp.eq.f32.partialorder %v600_v24, %v64_v26  ;;  %250 = vmin.xlane.f32.xlu1 %v717_v15  ;;  %265 = vmin.xlane.f32.xlu0 %v734_v20  ;;  %vm89_vm10 = vcmp.eq.f32.partialorder %v605_v25, %v67_v21  ;;  %v292_v31 = vshra.s32 %v742_v30, 16  ;;  %v750_v34 = vsel %vm25_vm0, %v135_v23, 2147483647 }
  0xaa   :  { %vm120_vm11 = vmor %vm88_vm9, %vm104_vm7  ;;  %v307_v35 = vshra.s32 %v750_v34, 16  ;;  %v203_v19 = vcvt.s32.f32 %v201_v13  ;;  %v218_v26 = vcvt.s32.f32 %v216_v52  ;;  %v233_v21 = vcvt.s32.f32 %v231_v60 }
  0xab   :  { %v136_v36 = vsel %vm120_vm11, %v626_v33, 16  ;;  %vm121_vm12 = vmor %vm89_vm10, %vm105_vm8  ;;  %v756_v24 = vcvt.s32.f32 %v292_v31  ;;  %v246_v62 = vand.u32 65535, %v706_v8  ;;  %v261_v6 = vand.u32 65535, %v720_v16 }
  0xac   :  { %v137_v37 = vsel %vm121_vm12, %v626_v33, 16  ;;  %v70_v38 = vpop.xlane.xlu0 %69  ;;  %v73_v25 = vpop.xlane.xlu1 %72  ;;  %v761_v39 = vcvt.s32.f32 %v307_v35  ;;  %v764_v41 = vsel %vm25_vm0, %v136_v36, 2147483647  ;;  %v276_v8 = vand.u32 65535, %v728_v18 }
  0xad   :  { %vm90_vm15 = vcmp.eq.f32.partialorder %v614_v28, %v70_v38  ;;  %280 = vmin.xlane.f32.xlu1 %v739_v27  ;;  %295 = vmin.xlane.f32.xlu0 %v756_v24  ;;  %vm91_vm1 = vcmp.eq.f32.partialorder %v619_v29, %v73_v25  ;;  %v322_v43 = vshra.s32 %v764_v41, 16  ;;  %v772_v44 = vsel %vm25_vm0, %v137_v37, 2147483647 }
  0xae   :  { %vm122_vm2 = vmor %vm90_vm15, %vm106_vm13  ;;  %v337_v46 = vshra.s32 %v772_v44, 16  ;;  %v248_v36 = vcvt.s32.f32 %v246_v62  ;;  %v263_v37 = vcvt.s32.f32 %v261_v6  ;;  %v291_v16 = vand.u32 65535, %v742_v30 }
  0xaf   :  { %v138_v47 = vsel %vm122_vm2, %v626_v33, 16  ;;  %vm123_vm3 = vmor %vm91_vm1, %vm107_vm14  ;;  %v776_v48 = vcvt.s32.f32 %v322_v43  ;;  %v278_v43 = vcvt.s32.f32 %v276_v8  ;;  %v306_v18 = vand.u32 65535, %v750_v34 }
  0xb0   :  { %v139_v28 = vsel %vm123_vm3, %v626_v33, 16  ;;  %v780_v51 = vsel %vm25_vm0, %v138_v47, 2147483647  ;;  %v784_v29 = vcvt.s32.f32 %v337_v46  ;;  %v293_v46 = vcvt.s32.f32 %v291_v16 }
  0xb1   :  { %310 = vmin.xlane.f32.xlu1 %v761_v39  ;;  %325 = vmin.xlane.f32.xlu0 %v776_v48  ;;  %v352_v53 = vshra.s32 %v780_v51, 16  ;;  %v788_v54 = vsel %vm25_vm0, %v139_v28, 2147483647  ;;  %v321_v30 = vand.u32 65535, %v764_v41  ;;  %v336_v34 = vand.u32 65535, %v772_v44 }
  0xb2   :  { %v367_v56 = vshra.s32 %v788_v54, 16  ;;  %v351_v41 = vand.u32 65535, %v780_v51  ;;  %v366_v44 = vand.u32 65535, %v788_v54  ;;  %v384_v13 = vadd.s32 4294967288, %v626_v33 }
  0xb3   :  { %v791_v57 = vcvt.s32.f32 %v352_v53  ;;  %v308_v53 = vcvt.s32.f32 %v306_v18  ;;  %v338_v2 = vcvt.s32.f32 %v336_v34 }
  0xb4   :  { %v795_v58 = vcvt.s32.f32 %v367_v56  ;;  %v323_v56 = vcvt.s32.f32 %v321_v30  ;;  %v353_v3 = vcvt.s32.f32 %v351_v41 }
  0xb5   :  { %340 = vmin.xlane.f32.xlu1 %v784_v29  ;;  %355 = vmin.xlane.f32.xlu0 %v791_v57 }
  0xb9   :  { %370 = vmin.xlane.f32.xlu1 %v795_v58 }
 0x126   :  { %v799_v63 = vpop.xlane.xlu0 %145 }
 0x127   :  { %vm147_vm4 = vcmp.eq.f32.partialorder %v647_v45, %v799_v63  ;;  %v152_v54 = vcvt.f32.s32 %v799_v63 }
 0x128   :  { %v148_v4 = vsel %vm147_vm4, %v143_v0, inf }
 0x129   :  { %149 = vmin.xlane.f32.xlu0 %v148_v4  ;;  %v368_v4 = vcvt.s32.f32 %v366_v44 }
 0x12a   :  { %v805_v7 = vpop.xlane.xlu1 %160  ;;  %v807_v9 = vpop.xlane.xlu0 %175 }
 0x12b   :  { %vm162_vm5 = vcmp.eq.f32.partialorder %v668_v55, %v805_v7  ;;  %vm177_vm6 = vcmp.eq.f32.partialorder %v652_v49, %v807_v9 }
 0x12c   :  { %v163_v42 = vsel %vm162_vm5, %v158_v10, inf  ;;  %v178_v45 = vsel %vm177_vm6, %v173_v12, inf  ;;  %v167_v12 = vcvt.f32.s32 %v805_v7  ;;  %vm389_vm5 = vcmask 130112  }
 0x12d   :  { %164 = vmin.xlane.f32.xlu1 %v163_v42  ;;  %179 = vmin.xlane.f32.xlu0 %v178_v45  ;;  %v182_v42 = vcvt.f32.s32 %v807_v9  ;;  %v153_v45 = vshll.u32 %v152_v54, 16  ;;  %vm454_vm6 = vcmask 1041409  }
 0x12e   :  { %v815_v50 = vpop.xlane.xlu1 %190  ;;  %v817_v14 = vpop.xlane.xlu0 %205 }
 0x12f   :  { %vm192_vm7 = vcmp.eq.f32.partialorder %v673_v59, %v815_v50  ;;  %vm207_vm8 = vcmp.eq.f32.partialorder %v690_v1, %v817_v14 }
 0x130   :  { %v193_v49 = vsel %vm192_vm7, %v188_v17, inf  ;;  %v208_v55 = vsel %vm207_vm8, %v203_v19, inf  ;;  %v168_v17 = vshll.u32 %v167_v12, 16  ;;  %v197_v19 = vcvt.f32.s32 %v815_v50 }
 0x131   :  { %194 = vmin.xlane.f32.xlu1 %v193_v49  ;;  %209 = vmin.xlane.f32.xlu0 %v208_v55  ;;  %v183_v55 = vshll.u32 %v182_v42, 16  ;;  %vm456_vm7 = vcmask 1042434   ;;  %vm458_vm8 = vcmask 1043459  }
 0x132   :  { %v825_v22 = vpop.xlane.xlu1 %220  ;;  %v827_v23 = vpop.xlane.xlu0 %235  ;;  %v198_v62 = vshll.u32 %v197_v19, 16 }
 0x133   :  { %vm222_vm9 = vcmp.eq.f32.partialorder %v695_v5, %v825_v22  ;;  %vm237_vm10 = vcmp.eq.f32.partialorder %v712_v11, %v827_v23  ;;  %v227_v9 = vcvt.f32.s32 %v825_v22  ;;  %v242_v8 = vcvt.f32.s32 %v827_v23 }
 0x134   :  { %v223_v59 = vsel %vm222_vm9, %v218_v26, inf  ;;  %v238_v1 = vsel %vm237_vm10, %v233_v21, inf  ;;  %v212_v26 = vcvt.f32.s32 %v817_v14  ;;  %vm460_vm9 = vcmask 1044484  }
 0x135   :  { %224 = vmin.xlane.f32.xlu1 %v223_v59  ;;  %239 = vmin.xlane.f32.xlu0 %v238_v1  ;;  %vm462_vm10 = vcmask 1045509  }
 0x136   :  { %v835_v31 = vpop.xlane.xlu1 %250  ;;  %v837_v35 = vpop.xlane.xlu0 %265  ;;  %v213_v16 = vshll.u32 %v212_v26, 16 }
 0x137   :  { %vm252_vm11 = vcmp.eq.f32.partialorder %v717_v15, %v835_v31  ;;  %vm267_vm12 = vcmp.eq.f32.partialorder %v734_v20, %v837_v35  ;;  %v272_v23 = vcvt.f32.s32 %v837_v35 }
 0x138   :  { %v253_v5 = vsel %vm252_vm11, %v248_v36, inf  ;;  %v268_v11 = vsel %vm267_vm12, %v263_v37, inf  ;;  %vm464_vm11 = vcmask 1046534   ;;  %vm466_vm12 = vcmask 1047559  }
 0x139   :  { %254 = vmin.xlane.f32.xlu1 %v253_v5  ;;  %269 = vmin.xlane.f32.xlu0 %v268_v11  ;;  %v228_v11 = vshll.u32 %v227_v9, 16  ;;  %v273_v35 = vshll.u32 %v272_v23, 16 }
 0x13a   :  { %v845_v38 = vpop.xlane.xlu1 %280  ;;  %v847_v25 = vpop.xlane.xlu0 %295 }
 0x13b   :  { %vm282_vm13 = vcmp.eq.f32.partialorder %v739_v27, %v845_v38  ;;  %vm297_vm14 = vcmp.eq.f32.partialorder %v756_v24, %v847_v25  ;;  %v287_v34 = vcvt.f32.s32 %v845_v38  ;;  %v302_v54 = vcvt.f32.s32 %v847_v25 }
 0x13c   :  { %v283_v15 = vsel %vm282_vm13, %v278_v43, inf  ;;  %v298_v20 = vsel %vm297_vm14, %v293_v46, inf  ;;  %v257_v43 = vcvt.f32.s32 %v835_v31 }
 0x13d   :  { %284 = vmin.xlane.f32.xlu1 %v283_v15  ;;  %299 = vmin.xlane.f32.xlu0 %v298_v20  ;;  %v288_v12 = vshll.u32 %v287_v34, 16 }
 0x13e   :  { %v855_v47 = vpop.xlane.xlu1 %310  ;;  %v857_v28 = vpop.xlane.xlu0 %325 }
 0x13f   :  { %vm312_vm15 = vcmp.eq.f32.partialorder %v761_v39, %v855_v47  ;;  %vm327_vm1 = vcmp.eq.f32.partialorder %v776_v48, %v857_v28  ;;  %v332_v25 = vcvt.f32.s32 %v857_v28 }
 0x140   :  { %v313_v27 = vsel %vm312_vm15, %v308_v53, inf  ;;  %v328_v24 = vsel %vm327_vm1, %v323_v56, inf  ;;  %v243_v56 = vshll.u32 %v242_v8, 16 }
 0x141   :  { %314 = vmin.xlane.f32.xlu1 %v313_v27  ;;  %329 = vmin.xlane.f32.xlu0 %v328_v24  ;;  %v258_v24 = vshll.u32 %v257_v43, 16 }
 0x142   :  { %v865_v61 = vpop.xlane.xlu1 %340  ;;  %v867_v0 = vpop.xlane.xlu0 %355 }
 0x143   :  { %vm342_vm2 = vcmp.eq.f32.partialorder %v784_v29, %v865_v61  ;;  %vm357_vm3 = vcmp.eq.f32.partialorder %v791_v57, %v867_v0  ;;  %v381_v29 = vshrl.u32 %v74_v32, 7  ;;  %v362_v28 = vcvt.f32.s32 %v867_v0 }
 0x144   :  { %v343_v39 = vsel %vm342_vm2, %v338_v2, inf  ;;  %v358_v48 = vsel %vm357_vm3, %v353_v3, inf }
 0x145   :  { %344 = vmin.xlane.f32.xlu1 %v343_v39  ;;  %359 = vmin.xlane.f32.xlu0 %v358_v48  ;;  %v887_v49 = vsub.s32 %v384_v13, %v381_v29 }
 0x146   :  { %v874_v51 = vpop.xlane.xlu1 %370 }
 0x147   :  { %vm372_vm4 = vcmp.eq.f32.partialorder %v795_v58, %v874_v51  ;;  %v885_v58 = vsub.s32 %v626_v33, %v381_v29  ;;  %v377_v8 = vcvt.f32.s32 %v874_v51 }
 0x148   :  { %v373_v10 = vsel %vm372_vm4, %v368_v4, inf }
 0x149   :  { %374 = vmin.xlane.f32.xlu1 %v373_v10 }
 0x1b6   :  { %v150_v40 = vpop.xlane.xlu0 %149 }
 0x1b7   :  { %v151_v57 = vcvt.f32.s32 %v150_v40  ;;  %v317_v40 = vcvt.f32.s32 %v855_v47 }
 0x1b9   :  { %v154_v63 = vadd.s32 %v153_v45, %v151_v57  ;;  %v318_v47 = vshll.u32 %v317_v40, 16 }
 0x1ba   :  { %v165_v52 = vpop.xlane.xlu1 %164  ;;  %v180_v60 = vpop.xlane.xlu0 %179 }
 0x1bb   :  { %v166_v7 = vcvt.f32.s32 %v165_v52  ;;  %v181_v32 = vcvt.f32.s32 %v180_v60  ;;  %v383_v33 = vrot.slane %v154_v63, %v885_v58  ;;  %v303_v63 = vshll.u32 %v302_v54, 16 }
 0x1bd   :  { %v169_v21 = vadd.s32 %v168_v17, %v166_v7  ;;  %v184_v6 = vadd.s32 %v183_v55, %v181_v32  ;;  %v347_v7 = vcvt.f32.s32 %v865_v61 }
 0x1be   :  { %v195_v50 = vpop.xlane.xlu1 %194  ;;  %v210_v59 = vpop.xlane.xlu0 %209 }
 0x1bf   :  { %v388_v1 = vrot.slane %v169_v21, %v887_v49  ;;  %v196_v36 = vcvt.f32.s32 %v195_v50  ;;  %v211_v37 = vcvt.f32.s32 %v210_v59  ;;  %v394_v22 = vrot.slane %v184_v6, %v885_v58 }
 0x1c1   :  { %v390_v5 = vsel %vm389_vm5, %v388_v1, %v383_v33  ;;  %v199_v14 = vadd.s32 %v198_v62, %v196_v36  ;;  %v214_v15 = vadd.s32 %v213_v16, %v211_v37  ;;  %v333_v1 = vshll.u32 %v332_v25, 16 }
 0x1c2   :  { %v225_v46 = vpop.xlane.xlu1 %224  ;;  %v240_v18 = vpop.xlane.xlu0 %239  ;;  %v348_v36 = vshll.u32 %v347_v7, 16 }
 0x1c3   :  { %v398_v30 = vrot.slane %v199_v14, %v887_v49  ;;  %v226_v20 = vcvt.f32.s32 %v225_v46  ;;  %v241_v53 = vcvt.f32.s32 %v240_v18  ;;  %v403_v39 = vrot.slane %v214_v15, %v885_v58 }
 0x1c5   :  { %v399_v41 = vsel %vm389_vm5, %v398_v30, %v394_v22  ;;  %v229_v27 = vadd.s32 %v228_v11, %v226_v20  ;;  %v244_v2 = vadd.s32 %v243_v56, %v241_v53  ;;  %v363_v30 = vshll.u32 %v362_v28, 16 }
 0x1c6   :  { %v455_v31 = vsel %vm454_vm6, %v399_v41, %v390_v5  ;;  %v255_v3 = vpop.xlane.xlu1 %254  ;;  %v270_v44 = vpop.xlane.xlu0 %269  ;;  %v378_v20 = vshll.u32 %v377_v8, 16 }
 0x1c7   :  { %v407_v48 = vrot.slane %v229_v27, %v887_v49  ;;  %v256_v4 = vcvt.f32.s32 %v255_v3  ;;  %v271_v10 = vcvt.f32.s32 %v270_v44  ;;  %v412_v13 = vrot.slane %v244_v2, %v885_v58 }
 0x1c9   :  { %v408_v38 = vsel %vm389_vm5, %v407_v48, %v403_v39  ;;  %v259_v29 = vadd.s32 %v258_v24, %v256_v4  ;;  %v274_v19 = vadd.s32 %v273_v35, %v271_v10 }
 0x1ca   :  { %v457_v57 = vsel %vm456_vm7, %v408_v38, %v455_v31  ;;  %v285_v42 = vpop.xlane.xlu1 %284  ;;  %v300_v45 = vpop.xlane.xlu0 %299 }
 0x1cb   :  { %v416_v17 = vrot.slane %v259_v29, %v887_v49  ;;  %v286_v52 = vcvt.f32.s32 %v285_v42  ;;  %v301_v60 = vcvt.f32.s32 %v300_v45  ;;  %v421_v6 = vrot.slane %v274_v19, %v885_v58 }
 0x1cd   :  { %v417_v32 = vsel %vm389_vm5, %v416_v17, %v412_v13  ;;  %v289_v55 = vadd.s32 %v288_v12, %v286_v52  ;;  %v304_v21 = vadd.s32 %v303_v63, %v301_v60 }
 0x1ce   :  { %v459_v26 = vsel %vm458_vm8, %v417_v32, %v457_v57  ;;  %v315_v62 = vpop.xlane.xlu1 %314  ;;  %v330_v9 = vpop.xlane.xlu0 %329 }
 0x1cf   :  { %v425_v50 = vrot.slane %v289_v55, %v887_v49  ;;  %v316_v59 = vcvt.f32.s32 %v315_v62  ;;  %v331_v33 = vcvt.f32.s32 %v330_v9  ;;  %v430_v16 = vrot.slane %v304_v21, %v885_v58 }
 0x1d1   :  { %v426_v61 = vsel %vm389_vm5, %v425_v50, %v421_v6  ;;  %v319_v37 = vadd.s32 %v318_v47, %v316_v59  ;;  %v334_v22 = vadd.s32 %v333_v1, %v331_v33 }
 0x1d2   :  { %v345_v5 = vpop.xlane.xlu1 %344  ;;  %v360_v14 = vpop.xlane.xlu0 %359  ;;  %v461_v11 = vsel %vm460_vm9, %v426_v61, %v459_v26 }
 0x1d3   :  { %v434_v43 = vrot.slane %v319_v37, %v887_v49  ;;  %v346_v46 = vcvt.f32.s32 %v345_v5  ;;  %v361_v18 = vcvt.f32.s32 %v360_v14  ;;  %v439_v51 = vrot.slane %v334_v22, %v885_v58 }
 0x1d5   :  { %v435_v15 = vsel %vm389_vm5, %v434_v43, %v430_v16  ;;  %v349_v0 = vadd.s32 %v348_v36, %v346_v46  ;;  %v364_v34 = vadd.s32 %v363_v30, %v361_v18 }
 0x1d6   :  { %v375_v53 = vpop.xlane.xlu1 %374  ;;  %v463_v56 = vsel %vm462_vm10, %v435_v15, %v461_v11 }
 0x1d7   :  { %v443_v23 = vrot.slane %v349_v0, %v887_v49  ;;  %v376_v41 = vcvt.f32.s32 %v375_v53  ;;  %v448_v2 = vrot.slane %v364_v34, %v885_v58 }
 0x1d9   :  { %v379_v27 = vadd.s32 %v378_v20, %v376_v41  ;;  %v444_v24 = vsel %vm389_vm5, %v443_v23, %v439_v51 }
 0x1da   :  { %v465_v31 = vsel %vm464_vm11, %v444_v24, %v463_v56 }
 0x1db   :  { %v452_v3 = vrot.slane %v379_v27, %v887_v49 }
 0x1dd   :  { %v453_v44 = vsel %vm389_vm5, %v452_v3, %v448_v2 }
 0x1de   :  { %v467_v39 = vsel %vm466_vm12, %v453_v44, %v465_v31 }
 0x1df   :  { %468 = vst.msk [vmem:[#allocation2] sm:$0xff] %vm25_vm0, %v467_v39 }
 0x1e0   :  { %495 = shalt.err (!%p492_p4)
}
 0x1e1   :  { %s496_s13 = scalar_lea.hbm %s939_s1, 128 }
 0x1e2   :  { %p497_p5 = scmp.ne.s32.totalorder %s939_s1, %s496_s13  ;;  %p500_p6 = scmp.lt.u32.totalorder %s496_s13, %s939_s1 }
 0x1e4   :  { %p502_p7 = pnand %p500_p6, %p497_p5 }
 0x1e6   :  { %505 = shalt.err (!%p502_p7)
}
 0x1e7   :  { %478 = dma.vmem_to_hbm [thread:$0]  %s476_s9, 128, %s939_s1, [#allocation3]  }
 0x1e8   :  { %506 = dma.done.wait [#allocation3], 128  }
 0x1e9   :  { %507 = vsyncadd [#allocation3], 4294967168 }
 0x1ea   :  { %482 = vsyncpa [#allocation3], 1 }

// kernel: tpu_custom_call.1
= control target key start
LH: loop header
LB: loop body
LE: loop exit
PB: predicated region body
PF: predicated region fallthrough
CT: control target
= control target key end

     0   :  { %vm24_vm0 = vcmask 130048   ;;  %v73_v32 = vlaneseq  ;;  %s848_s0 = inlined_call_operand.vmem [shape: f32[128,16], index: 0, kind: input, shape index: {}]   ;;  %s849_s1 = inlined_call_operand.vmem [shape: s32[128,1], index: 1, kind: output, shape index: {}]  }
   0x1   :  { %v8_v0 = vld [vmem:[%s848_s0] sm:$0xff]  ;;  %v10_v1 = vld [vmem:[%s848_s0 + $0x10] sm:$0xff]  ;;  %v419_v2 = vld [vmem:[%s848_s0 + $0x8] sm:$0xff] }
   0x2   :  { %v25_v3 = vsel %vm24_vm0, %v8_v0, -inf  ;;  %v31_v4 = vsel %vm24_vm0, %v10_v1, -inf  ;;  %v426_v5 = vld [vmem:[%s848_s0 + $0x18] sm:$0xff]  ;;  %v28_v6 = vsel %vm24_vm0, %v419_v2, -inf  ;;  %v435_v8 = vld [vmem:[%s848_s0 + $0x20] sm:$0xff]  ;;  %v440_v9 = vld [vmem:[%s848_s0 + $0x28] sm:$0xff]  ;;  %vm91_vm1 = vcmp.ne.f32.partialorder %v8_v0, %v8_v0 }
   0x3   :  { %26 = vmax.xlane.f32.xlu0 %v25_v3  ;;  %32 = vmax.xlane.f32.xlu1 %v31_v4  ;;  %v34_v7 = vsel %vm24_vm0, %v426_v5, -inf  ;;  %v37_v10 = vsel %vm24_vm0, %v435_v8, -inf  ;;  %v40_v11 = vsel %vm24_vm0, %v440_v9, -inf  ;;  %v449_v12 = vld [vmem:[%s848_s0 + $0x30] sm:$0xff]  ;;  %v454_v13 = vld [vmem:[%s848_s0 + $0x38] sm:$0xff]  ;;  %v463_v16 = vld [vmem:[%s848_s0 + $0x40] sm:$0xff]  ;;  %vm93_vm2 = vcmp.ne.f32.partialorder %v10_v1, %v10_v1 }
   0x4   :  { %v43_v14 = vsel %vm24_vm0, %v449_v12, -inf  ;;  %v46_v15 = vsel %vm24_vm0, %v454_v13, -inf  ;;  %v468_v17 = vld [vmem:[%s848_s0 + $0x48] sm:$0xff]  ;;  %v49_v18 = vsel %vm24_vm0, %v463_v16, -inf  ;;  %v477_v20 = vld [vmem:[%s848_s0 + $0x50] sm:$0xff]  ;;  %v482_v21 = vld [vmem:[%s848_s0 + $0x58] sm:$0xff]  ;;  %vm92_vm7 = vcmp.ne.f32.partialorder %v419_v2, %v419_v2 }
   0x5   :  { %v52_v19 = vsel %vm24_vm0, %v468_v17, -inf  ;;  %v55_v22 = vsel %vm24_vm0, %v477_v20, -inf  ;;  %v58_v23 = vsel %vm24_vm0, %v482_v21, -inf  ;;  %v491_v24 = vld [vmem:[%s848_s0 + $0x60] sm:$0xff]  ;;  %v496_v25 = vld [vmem:[%s848_s0 + $0x68] sm:$0xff]  ;;  %v505_v28 = vld [vmem:[%s848_s0 + $0x70] sm:$0xff]  ;;  %vm94_vm8 = vcmp.ne.f32.partialorder %v426_v5, %v426_v5 }
   0x6   :  { %v61_v26 = vsel %vm24_vm0, %v491_v24, -inf  ;;  %v64_v27 = vsel %vm24_vm0, %v496_v25, -inf  ;;  %v510_v29 = vld [vmem:[%s848_s0 + $0x78] sm:$0xff]  ;;  %v67_v30 = vsel %vm24_vm0, %v505_v28, -inf  ;;  %v516_v33 = vand.u32 127, %v73_v32 }
   0x7   :  { %29 = vmax.xlane.f32.xlu0 %v28_v6  ;;  %35 = vmax.xlane.f32.xlu1 %v34_v7  ;;  %v70_v31 = vsel %vm24_vm0, %v510_v29, -inf  ;;  %vm95_vm13 = vcmp.ne.f32.partialorder %v435_v8, %v435_v8  ;;  %vm96_vm14 = vcmp.ne.f32.partialorder %v440_v9, %v440_v9 }
   0xb   :  { %38 = vmax.xlane.f32.xlu0 %v37_v10  ;;  %41 = vmax.xlane.f32.xlu1 %v40_v11 }
   0xf   :  { %44 = vmax.xlane.f32.xlu0 %v43_v14  ;;  %47 = vmax.xlane.f32.xlu1 %v46_v15 }
  0x13   :  { %50 = vmax.xlane.f32.xlu0 %v49_v18  ;;  %53 = vmax.xlane.f32.xlu1 %v52_v19 }
  0x17   :  { %56 = vmax.xlane.f32.xlu0 %v55_v22  ;;  %59 = vmax.xlane.f32.xlu1 %v58_v23 }
  0x1b   :  { %62 = vmax.xlane.f32.xlu0 %v61_v26  ;;  %65 = vmax.xlane.f32.xlu1 %v64_v27 }
  0x1f   :  { %68 = vmax.xlane.f32.xlu0 %v67_v30  ;;  %71 = vmax.xlane.f32.xlu1 %v70_v31 }
  0x90   :  { %v27_v34 = vpop.xlane.xlu0 %26  ;;  %v33_v35 = vpop.xlane.xlu1 %32 }
  0x91   :  { %vm75_vm3 = vcmp.eq.f32.partialorder %v8_v0, %v27_v34  ;;  %vm77_vm4 = vcmp.eq.f32.partialorder %v10_v1, %v33_v35 }
  0x92   :  { %vm107_vm5 = vmor %vm75_vm3, %vm91_vm1 }
  0x93   :  { %v123_v36 = vsel %vm107_vm5, %v516_v33, 16  ;;  %vm109_vm6 = vmor %vm77_vm4, %vm93_vm2  ;;  %vm97_vm4 = vcmp.ne.f32.partialorder %v449_v12, %v449_v12  ;;  %vm98_vm5 = vcmp.ne.f32.partialorder %v454_v13, %v454_v13 }
  0x94   :  { %v125_v37 = vsel %vm109_vm6, %v516_v33, 16  ;;  %v30_v38 = vpop.xlane.xlu0 %29  ;;  %v36_v39 = vpop.xlane.xlu1 %35  ;;  %v525_v40 = vsel %vm24_vm0, %v123_v36, 2147483647 }
  0x95   :  { %vm76_vm9 = vcmp.eq.f32.partialorder %v419_v2, %v30_v38  ;;  %vm78_vm10 = vcmp.eq.f32.partialorder %v426_v5, %v36_v39  ;;  %v141_v41 = vshra.s32 %v525_v40, 16  ;;  %v531_v42 = vsel %vm24_vm0, %v125_v37, 2147483647 }
  0x96   :  { %vm108_vm11 = vmor %vm76_vm9, %vm92_vm7  ;;  %v171_v43 = vshra.s32 %v531_v42, 16 }
  0x97   :  { %v124_v44 = vsel %vm108_vm11, %v516_v33, 16  ;;  %vm110_vm12 = vmor %vm78_vm10, %vm94_vm8  ;;  %v537_v45 = vcvt.s32.f32 %v141_v41  ;;  %vm99_vm10 = vcmp.ne.f32.partialorder %v463_v16, %v463_v16  ;;  %vm100_vm11 = vcmp.ne.f32.partialorder %v468_v17, %v468_v17 }
  0x98   :  { %v126_v46 = vsel %vm110_vm12, %v516_v33, 16  ;;  %v39_v47 = vpop.xlane.xlu0 %38  ;;  %v42_v48 = vpop.xlane.xlu1 %41  ;;  %v542_v49 = vcvt.s32.f32 %v171_v43  ;;  %v545_v50 = vsel %vm24_vm0, %v124_v44, 2147483647 }
  0x99   :  { %vm79_vm15 = vcmp.eq.f32.partialorder %v435_v8, %v39_v47  ;;  %144 = vmin.xlane.f32.xlu0 %v537_v45  ;;  %vm80_vm1 = vcmp.eq.f32.partialorder %v440_v9, %v42_v48  ;;  %v156_v51 = vshra.s32 %v545_v50, 16  ;;  %v552_v52 = vsel %vm24_vm0, %v126_v46, 2147483647 }
  0x9a   :  { %vm111_vm2 = vmor %vm79_vm15, %vm95_vm13  ;;  %v186_v53 = vshra.s32 %v552_v52, 16 }
  0x9b   :  { %v127_v54 = vsel %vm111_vm2, %v516_v33, 16  ;;  %vm112_vm3 = vmor %vm80_vm1, %vm96_vm14  ;;  %v558_v55 = vcvt.s32.f32 %v156_v51  ;;  %vm101_vm1 = vcmp.ne.f32.partialorder %v477_v20, %v477_v20  ;;  %vm102_vm2 = vcmp.ne.f32.partialorder %v482_v21, %v482_v21 }
  0x9c   :  { %v128_v56 = vsel %vm112_vm3, %v516_v33, 16  ;;  %v45_v57 = vpop.xlane.xlu0 %44  ;;  %v48_v58 = vpop.xlane.xlu1 %47  ;;  %v563_v59 = vcvt.s32.f32 %v186_v53  ;;  %v566_v60 = vsel %vm24_vm0, %v127_v54, 2147483647 }
  0x9d   :  { %vm81_vm6 = vcmp.eq.f32.partialorder %v449_v12, %v45_v57  ;;  %174 = vmin.xlane.f32.xlu0 %v542_v49  ;;  %159 = vmin.xlane.f32.xlu1 %v558_v55  ;;  %vm82_vm7 = vcmp.eq.f32.partialorder %v454_v13, %v48_v58  ;;  %v201_v61 = vshra.s32 %v566_v60, 16  ;;  %v574_v62 = vsel %vm24_vm0, %v128_v56, 2147483647 }
  0x9e   :  { %vm113_vm8 = vmor %vm81_vm6, %vm97_vm4  ;;  %v216_v63 = vshra.s32 %v574_v62, 16  ;;  %v140_v57 = vand.u32 65535, %v525_v40  ;;  %v185_v40 = vand.u32 65535, %v552_v52  ;;  %v215_v52 = vand.u32 65535, %v574_v62 }
  0x9f   :  { %v129_v0 = vsel %vm113_vm8, %v516_v33, 16  ;;  %vm114_vm9 = vmor %vm82_vm7, %vm98_vm5  ;;  %v580_v1 = vcvt.s32.f32 %v201_v61  ;;  %vm103_vm7 = vcmp.ne.f32.partialorder %v491_v24, %v491_v24  ;;  %vm104_vm8 = vcmp.ne.f32.partialorder %v496_v25, %v496_v25 }
  0xa0   :  { %v130_v2 = vsel %vm114_vm9, %v516_v33, 16  ;;  %v51_v3 = vpop.xlane.xlu0 %50  ;;  %v54_v4 = vpop.xlane.xlu1 %53  ;;  %v585_v5 = vcvt.s32.f32 %v216_v63  ;;  %v588_v6 = vsel %vm24_vm0, %v129_v0, 2147483647  ;;  %v142_v61 = vcvt.s32.f32 %v140_v57 }
  0xa1   :  { %vm83_vm12 = vcmp.eq.f32.partialorder %v463_v16, %v51_v3  ;;  %189 = vmin.xlane.f32.xlu1 %v563_v59  ;;  %204 = vmin.xlane.f32.xlu0 %v580_v1  ;;  %vm84_vm13 = vcmp.eq.f32.partialorder %v468_v17, %v54_v4  ;;  %v231_v7 = vshra.s32 %v588_v6, 16  ;;  %v596_v8 = vsel %vm24_vm0, %v130_v2, 2147483647 }
  0xa2   :  { %vm115_vm14 = vmor %vm83_vm12, %vm99_vm10  ;;  %v246_v9 = vshra.s32 %v596_v8, 16  ;;  %v155_v63 = vand.u32 65535, %v545_v50  ;;  %v170_v0 = vand.u32 65535, %v531_v42  ;;  %v245_v62 = vand.u32 65535, %v596_v8 }
  0xa3   :  { %v131_v10 = vsel %vm115_vm14, %v516_v33, 16  ;;  %vm116_vm15 = vmor %vm84_vm13, %vm100_vm11  ;;  %v602_v11 = vcvt.s32.f32 %v231_v7  ;;  %vm105_vm13 = vcmp.ne.f32.partialorder %v505_v28, %v505_v28  ;;  %vm106_vm14 = vcmp.ne.f32.partialorder %v510_v29, %v510_v29 }
  0xa4   :  { %v132_v12 = vsel %vm116_vm15, %v516_v33, 16  ;;  %v57_v13 = vpop.xlane.xlu0 %56  ;;  %v60_v14 = vpop.xlane.xlu1 %59  ;;  %v607_v15 = vcvt.s32.f32 %v246_v9  ;;  %v610_v16 = vsel %vm24_vm0, %v131_v10, 2147483647  ;;  %v157_v7 = vcvt.s32.f32 %v155_v63 }
  0xa5   :  { %vm85_vm3 = vcmp.eq.f32.partialorder %v477_v20, %v57_v13  ;;  %219 = vmin.xlane.f32.xlu1 %v585_v5  ;;  %234 = vmin.xlane.f32.xlu0 %v602_v11  ;;  %vm86_vm4 = vcmp.eq.f32.partialorder %v482_v21, %v60_v14  ;;  %v261_v17 = vshra.s32 %v610_v16, 16  ;;  %v618_v18 = vsel %vm24_vm0, %v132_v12, 2147483647 }
  0xa6   :  { %vm117_vm5 = vmor %vm85_vm3, %vm101_vm1  ;;  %v276_v19 = vshra.s32 %v618_v18, 16  ;;  %v172_v9 = vcvt.s32.f32 %v170_v0  ;;  %v200_v10 = vand.u32 65535, %v566_v60  ;;  %v187_v13 = vcvt.s32.f32 %v185_v40 }
  0xa7   :  { %v133_v22 = vsel %vm117_vm5, %v516_v33, 16  ;;  %vm118_vm6 = vmor %vm86_vm4, %vm102_vm2  ;;  %v624_v20 = vcvt.s32.f32 %v261_v17  ;;  %v230_v60 = vand.u32 65535, %v588_v6  ;;  %v260_v6 = vand.u32 65535, %v610_v16 }
  0xa8   :  { %v134_v23 = vsel %vm118_vm6, %v516_v33, 16  ;;  %v63_v26 = vpop.xlane.xlu0 %62  ;;  %v66_v21 = vpop.xlane.xlu1 %65  ;;  %v629_v27 = vcvt.s32.f32 %v276_v19  ;;  %v632_v30 = vsel %vm24_vm0, %v133_v22, 2147483647  ;;  %v202_v14 = vcvt.s32.f32 %v200_v10 }
  0xa9   :  { %vm87_vm9 = vcmp.eq.f32.partialorder %v491_v24, %v63_v26  ;;  %249 = vmin.xlane.f32.xlu1 %v607_v15  ;;  %264 = vmin.xlane.f32.xlu0 %v624_v20  ;;  %vm88_vm10 = vcmp.eq.f32.partialorder %v496_v25, %v66_v21  ;;  %v291_v31 = vshra.s32 %v632_v30, 16  ;;  %v640_v32 = vsel %vm24_vm0, %v134_v23, 2147483647 }
  0xaa   :  { %vm119_vm11 = vmor %vm87_vm9, %vm103_vm7  ;;  %v306_v34 = vshra.s32 %v640_v32, 16  ;;  %v217_v22 = vcvt.s32.f32 %v215_v52  ;;  %v232_v23 = vcvt.s32.f32 %v230_v60  ;;  %v275_v8 = vand.u32 65535, %v618_v18 }
  0xab   :  { %v135_v35 = vsel %vm119_vm11, %v516_v33, 16  ;;  %vm120_vm12 = vmor %vm88_vm10, %vm104_vm8  ;;  %v646_v24 = vcvt.s32.f32 %v291_v31  ;;  %v247_v31 = vcvt.s32.f32 %v245_v62  ;;  %v290_v16 = vand.u32 65535, %v632_v30 }
  0xac   :  { %v136_v36 = vsel %vm120_vm12, %v516_v33, 16  ;;  %v69_v37 = vpop.xlane.xlu0 %68  ;;  %v72_v25 = vpop.xlane.xlu1 %71  ;;  %v651_v38 = vcvt.s32.f32 %v306_v34  ;;  %v654_v39 = vsel %vm24_vm0, %v135_v35, 2147483647  ;;  %v262_v34 = vcvt.s32.f32 %v260_v6 }
  0xad   :  { %vm89_vm15 = vcmp.eq.f32.partialorder %v505_v28, %v69_v37  ;;  %279 = vmin.xlane.f32.xlu1 %v629_v27  ;;  %294 = vmin.xlane.f32.xlu0 %v646_v24  ;;  %vm90_vm1 = vcmp.eq.f32.partialorder %v510_v29, %v72_v25  ;;  %v321_v41 = vshra.s32 %v654_v39, 16  ;;  %v662_v43 = vsel %vm24_vm0, %v136_v36, 2147483647 }
  0xae   :  { %vm121_vm2 = vmor %vm89_vm15, %vm105_vm13  ;;  %v336_v44 = vshra.s32 %v662_v43, 16  ;;  %v277_v37 = vcvt.s32.f32 %v275_v8  ;;  %v292_v25 = vcvt.s32.f32 %v290_v16  ;;  %v305_v18 = vand.u32 65535, %v640_v32 }
  0xaf   :  { %v137_v46 = vsel %vm121_vm2, %v516_v33, 16  ;;  %vm122_vm3 = vmor %vm90_vm1, %vm106_vm14  ;;  %v666_v47 = vcvt.s32.f32 %v321_v41  ;;  %v320_v30 = vand.u32 65535, %v654_v39  ;;  %v335_v32 = vand.u32 65535, %v662_v43 }
  0xb0   :  { %v138_v28 = vsel %vm122_vm3, %v516_v33, 16  ;;  %v670_v48 = vsel %vm24_vm0, %v137_v46, 2147483647  ;;  %v674_v29 = vcvt.s32.f32 %v336_v44  ;;  %v307_v46 = vcvt.s32.f32 %v305_v18 }
  0xb1   :  { %309 = vmin.xlane.f32.xlu1 %v651_v38  ;;  %324 = vmin.xlane.f32.xlu0 %v666_v47  ;;  %v351_v51 = vshra.s32 %v670_v48, 16  ;;  %v678_v53 = vsel %vm24_vm0, %v138_v28, 2147483647  ;;  %v322_v28 = vcvt.s32.f32 %v320_v30  ;;  %v350_v39 = vand.u32 65535, %v670_v48 }
  0xb2   :  { %v366_v54 = vshra.s32 %v678_v53, 16  ;;  %v337_v57 = vcvt.s32.f32 %v335_v32  ;;  %v365_v43 = vand.u32 65535, %v678_v53 }
  0xb3   :  { %v681_v56 = vcvt.s32.f32 %v351_v51 }
  0xb4   :  { %v685_v33 = vcvt.s32.f32 %v366_v54  ;;  %v367_v63 = vcvt.s32.f32 %v365_v43 }
  0xb5   :  { %339 = vmin.xlane.f32.xlu1 %v674_v29  ;;  %354 = vmin.xlane.f32.xlu0 %v681_v56 }
  0xb9   :  { %369 = vmin.xlane.f32.xlu1 %v685_v33 }
 0x126   :  { %v689_v58 = vpop.xlane.xlu0 %144 }
 0x127   :  { %vm146_vm0 = vcmp.eq.f32.partialorder %v537_v45, %v689_v58  ;;  %v151_v53 = vcvt.f32.s32 %v689_v58 }
 0x128   :  { %v147_v2 = vsel %vm146_vm0, %v142_v61, inf  ;;  %v352_v61 = vcvt.s32.f32 %v350_v39  ;;  %vm379_vm0 = vcmask 7168  }
 0x129   :  { %148 = vmin.xlane.f32.xlu0 %v147_v2 }
 0x12a   :  { %v695_v3 = vpop.xlane.xlu1 %159  ;;  %v697_v4 = vpop.xlane.xlu0 %174 }
 0x12b   :  { %vm161_vm4 = vcmp.eq.f32.partialorder %v558_v55, %v695_v3  ;;  %vm176_vm5 = vcmp.eq.f32.partialorder %v542_v49, %v697_v4  ;;  %v166_v2 = vcvt.f32.s32 %v695_v3 }
 0x12c   :  { %v162_v42 = vsel %vm161_vm4, %v157_v7, inf  ;;  %v177_v45 = vsel %vm176_vm5, %v172_v9, inf  ;;  %v152_v7 = vshll.u32 %v151_v53, 16 }
 0x12d   :  { %163 = vmin.xlane.f32.xlu1 %v162_v42  ;;  %178 = vmin.xlane.f32.xlu0 %v177_v45  ;;  %v167_v10 = vshll.u32 %v166_v2, 16 }
 0x12e   :  { %v705_v50 = vpop.xlane.xlu1 %189  ;;  %v707_v12 = vpop.xlane.xlu0 %204 }
 0x12f   :  { %vm191_vm6 = vcmp.eq.f32.partialorder %v563_v59, %v705_v50  ;;  %vm206_vm7 = vcmp.eq.f32.partialorder %v580_v1, %v707_v12  ;;  %v196_v42 = vcvt.f32.s32 %v705_v50 }
 0x130   :  { %v192_v49 = vsel %vm191_vm6, %v187_v13, inf  ;;  %v207_v55 = vsel %vm206_vm7, %v202_v14, inf }
 0x131   :  { %193 = vmin.xlane.f32.xlu1 %v192_v49  ;;  %208 = vmin.xlane.f32.xlu0 %v207_v55  ;;  %v197_v60 = vshll.u32 %v196_v42, 16 }
 0x132   :  { %v715_v17 = vpop.xlane.xlu1 %219  ;;  %v717_v19 = vpop.xlane.xlu0 %234 }
 0x133   :  { %vm221_vm8 = vcmp.eq.f32.partialorder %v585_v5, %v715_v17  ;;  %vm236_vm9 = vcmp.eq.f32.partialorder %v602_v11, %v717_v19  ;;  %v226_v49 = vcvt.f32.s32 %v715_v17 }
 0x134   :  { %v222_v59 = vsel %vm221_vm8, %v217_v22, inf  ;;  %v237_v1 = vsel %vm236_vm9, %v232_v23, inf  ;;  %v241_v23 = vcvt.f32.s32 %v717_v19 }
 0x135   :  { %223 = vmin.xlane.f32.xlu1 %v222_v59  ;;  %238 = vmin.xlane.f32.xlu0 %v237_v1  ;;  %v227_v17 = vshll.u32 %v226_v49, 16 }
 0x136   :  { %v725_v26 = vpop.xlane.xlu1 %249  ;;  %v727_v21 = vpop.xlane.xlu0 %264  ;;  %v242_v19 = vshll.u32 %v241_v23, 16 }
 0x137   :  { %vm251_vm10 = vcmp.eq.f32.partialorder %v607_v15, %v725_v26  ;;  %vm266_vm11 = vcmp.eq.f32.partialorder %v624_v20, %v727_v21  ;;  %v256_v1 = vcvt.f32.s32 %v725_v26  ;;  %v271_v8 = vcvt.f32.s32 %v727_v21 }
 0x138   :  { %v252_v5 = vsel %vm251_vm10, %v247_v31, inf  ;;  %v267_v11 = vsel %vm266_vm11, %v262_v34, inf }
 0x139   :  { %253 = vmin.xlane.f32.xlu1 %v252_v5  ;;  %268 = vmin.xlane.f32.xlu0 %v267_v11  ;;  %v257_v26 = vshll.u32 %v256_v1, 16  ;;  %v272_v21 = vshll.u32 %v271_v8, 16 }
 0x13a   :  { %v735_v35 = vpop.xlane.xlu1 %279  ;;  %v737_v36 = vpop.xlane.xlu0 %294 }
 0x13b   :  { %vm281_vm12 = vcmp.eq.f32.partialorder %v629_v27, %v735_v35  ;;  %vm296_vm13 = vcmp.eq.f32.partialorder %v646_v24, %v737_v36 }
 0x13c   :  { %v282_v15 = vsel %vm281_vm12, %v277_v37, inf  ;;  %v297_v20 = vsel %vm296_vm13, %v292_v25, inf  ;;  %v286_v25 = vcvt.f32.s32 %v735_v35 }
 0x13d   :  { %283 = vmin.xlane.f32.xlu1 %v282_v15  ;;  %298 = vmin.xlane.f32.xlu0 %v297_v20  ;;  %v301_v15 = vcvt.f32.s32 %v737_v36 }
 0x13e   :  { %v745_v41 = vpop.xlane.xlu1 %309  ;;  %v747_v44 = vpop.xlane.xlu0 %324  ;;  %v287_v35 = vshll.u32 %v286_v25, 16 }
 0x13f   :  { %vm311_vm14 = vcmp.eq.f32.partialorder %v651_v38, %v745_v41  ;;  %vm326_vm15 = vcmp.eq.f32.partialorder %v666_v47, %v747_v44  ;;  %v316_v39 = vcvt.f32.s32 %v745_v41  ;;  %v302_v36 = vshll.u32 %v301_v15, 16 }
 0x140   :  { %v312_v27 = vsel %vm311_vm14, %v307_v46, inf  ;;  %v327_v24 = vsel %vm326_vm15, %v322_v28, inf }
 0x141   :  { %313 = vmin.xlane.f32.xlu1 %v312_v27  ;;  %328 = vmin.xlane.f32.xlu0 %v327_v24  ;;  %v317_v41 = vshll.u32 %v316_v39, 16 }
 0x142   :  { %v755_v51 = vpop.xlane.xlu1 %339  ;;  %v757_v54 = vpop.xlane.xlu0 %354 }
 0x143   :  { %vm341_vm1 = vcmp.eq.f32.partialorder %v674_v29, %v755_v51  ;;  %vm356_vm2 = vcmp.eq.f32.partialorder %v681_v56, %v757_v54  ;;  %v181_v56 = vcvt.f32.s32 %v697_v4  ;;  %v361_v2 = vcvt.f32.s32 %v757_v54 }
 0x144   :  { %v342_v38 = vsel %vm341_vm1, %v337_v57, inf  ;;  %v357_v47 = vsel %vm356_vm2, %v352_v61, inf  ;;  %v331_v57 = vcvt.f32.s32 %v747_v44 }
 0x145   :  { %343 = vmin.xlane.f32.xlu1 %v342_v38  ;;  %358 = vmin.xlane.f32.xlu0 %v357_v47  ;;  %v182_v14 = vshll.u32 %v181_v56, 16  ;;  %v362_v42 = vshll.u32 %v361_v2, 16 }
 0x146   :  { %v764_v48 = vpop.xlane.xlu1 %369  ;;  %v332_v44 = vshll.u32 %v331_v57, 16 }
 0x147   :  { %vm371_vm3 = vcmp.eq.f32.partialorder %v685_v33, %v764_v48  ;;  %v211_v33 = vcvt.f32.s32 %v707_v12  ;;  %v376_v54 = vcvt.f32.s32 %v764_v48 }
 0x148   :  { %v372_v0 = vsel %vm371_vm3, %v367_v63, inf  ;;  %v346_v63 = vcvt.f32.s32 %v755_v51 }
 0x149   :  { %373 = vmin.xlane.f32.xlu1 %v372_v0  ;;  %v212_v50 = vshll.u32 %v211_v33, 16 }
 0x14a   :  { %v347_v51 = vshll.u32 %v346_v63, 16 }
 0x1b6   :  { %v149_v29 = vpop.xlane.xlu0 %148 }
 0x1b7   :  { %v150_v9 = vcvt.f32.s32 %v149_v29 }
 0x1b9   :  { %v153_v40 = vadd.s32 %v152_v7, %v150_v9 }
 0x1ba   :  { %v164_v45 = vpop.xlane.xlu1 %163  ;;  %v179_v13 = vpop.xlane.xlu0 %178 }
 0x1bb   :  { %380 = vst.msk [vmem:[%s849_s1] sm:$0xff] %vm379_vm0, %v153_v40  ;;  %v165_v58 = vcvt.f32.s32 %v164_v45  ;;  %v180_v3 = vcvt.f32.s32 %v179_v13 }
 0x1bd   :  { %v168_v52 = vadd.s32 %v167_v10, %v165_v58  ;;  %v183_v4 = vadd.s32 %v182_v14, %v180_v3  ;;  %v377_v3 = vshll.u32 %v376_v54, 16 }
 0x1be   :  { %v194_v55 = vpop.xlane.xlu1 %193  ;;  %v209_v22 = vpop.xlane.xlu0 %208 }
 0x1bf   :  { %381 = vst.msk [vmem:[%s849_s1 + $0x8] sm:$0xff] %vm379_vm0, %v168_v52  ;;  %382 = vst.msk [vmem:[%s849_s1 + $0x10] sm:$0xff] %vm379_vm0, %v183_v4  ;;  %v195_v12 = vcvt.f32.s32 %v194_v55  ;;  %v210_v62 = vcvt.f32.s32 %v209_v22 }
 0x1c1   :  { %v198_v6 = vadd.s32 %v197_v60, %v195_v12  ;;  %v213_v59 = vadd.s32 %v212_v50, %v210_v62 }
 0x1c2   :  { %v224_v31 = vpop.xlane.xlu1 %223  ;;  %v239_v34 = vpop.xlane.xlu0 %238 }
 0x1c3   :  { %383 = vst.msk [vmem:[%s849_s1 + $0x18] sm:$0xff] %vm379_vm0, %v198_v6  ;;  %384 = vst.msk [vmem:[%s849_s1 + $0x20] sm:$0xff] %vm379_vm0, %v213_v59  ;;  %v225_v16 = vcvt.f32.s32 %v224_v31  ;;  %v240_v5 = vcvt.f32.s32 %v239_v34 }
 0x1c5   :  { %v228_v11 = vadd.s32 %v227_v17, %v225_v16  ;;  %v243_v37 = vadd.s32 %v242_v19, %v240_v5 }
 0x1c6   :  { %v254_v18 = vpop.xlane.xlu1 %253  ;;  %v269_v30 = vpop.xlane.xlu0 %268 }
 0x1c7   :  { %385 = vst.msk [vmem:[%s849_s1 + $0x28] sm:$0xff] %vm379_vm0, %v228_v11  ;;  %386 = vst.msk [vmem:[%s849_s1 + $0x30] sm:$0xff] %vm379_vm0, %v243_v37  ;;  %v255_v20 = vcvt.f32.s32 %v254_v18  ;;  %v270_v46 = vcvt.f32.s32 %v269_v30 }
 0x1c9   :  { %v258_v28 = vadd.s32 %v257_v26, %v255_v20  ;;  %v273_v32 = vadd.s32 %v272_v21, %v270_v46 }
 0x1ca   :  { %v284_v27 = vpop.xlane.xlu1 %283  ;;  %v299_v24 = vpop.xlane.xlu0 %298 }
 0x1cb   :  { %387 = vst.msk [vmem:[%s849_s1 + $0x38] sm:$0xff] %vm379_vm0, %v258_v28  ;;  %388 = vst.msk [vmem:[%s849_s1 + $0x40] sm:$0xff] %vm379_vm0, %v273_v32  ;;  %v285_v61 = vcvt.f32.s32 %v284_v27  ;;  %v300_v43 = vcvt.f32.s32 %v299_v24 }
 0x1cd   :  { %v288_v38 = vadd.s32 %v287_v35, %v285_v61  ;;  %v303_v47 = vadd.s32 %v302_v36, %v300_v43 }
 0x1ce   :  { %v314_v0 = vpop.xlane.xlu1 %313  ;;  %v329_v53 = vpop.xlane.xlu0 %328 }
 0x1cf   :  { %389 = vst.msk [vmem:[%s849_s1 + $0x48] sm:$0xff] %vm379_vm0, %v288_v38  ;;  %390 = vst.msk [vmem:[%s849_s1 + $0x50] sm:$0xff] %vm379_vm0, %v303_v47  ;;  %v315_v29 = vcvt.f32.s32 %v314_v0  ;;  %v330_v7 = vcvt.f32.s32 %v329_v53 }
 0x1d1   :  { %v318_v56 = vadd.s32 %v317_v41, %v315_v29  ;;  %v333_v9 = vadd.s32 %v332_v44, %v330_v7 }
 0x1d2   :  { %v344_v40 = vpop.xlane.xlu1 %343  ;;  %v359_v10 = vpop.xlane.xlu0 %358 }
 0x1d3   :  { %391 = vst.msk [vmem:[%s849_s1 + $0x58] sm:$0xff] %vm379_vm0, %v318_v56  ;;  %392 = vst.msk [vmem:[%s849_s1 + $0x60] sm:$0xff] %vm379_vm0, %v333_v9  ;;  %v345_v45 = vcvt.f32.s32 %v344_v40  ;;  %v360_v13 = vcvt.f32.s32 %v359_v10 }
 0x1d5   :  { %v348_v14 = vadd.s32 %v347_v51, %v345_v45  ;;  %v363_v33 = vadd.s32 %v362_v42, %v360_v13 }
 0x1d6   :  { %v374_v58 = vpop.xlane.xlu1 %373 }
 0x1d7   :  { %393 = vst.msk [vmem:[%s849_s1 + $0x68] sm:$0xff] %vm379_vm0, %v348_v14  ;;  %394 = vst.msk [vmem:[%s849_s1 + $0x70] sm:$0xff] %vm379_vm0, %v363_v33  ;;  %v375_v48 = vcvt.f32.s32 %v374_v58 }
 0x1d9   :  { %v378_v52 = vadd.s32 %v377_v3, %v375_v48 }
 0x1db   :  { %395 = vst.msk [vmem:[%s849_s1 + $0x78] sm:$0xff] %vm379_vm0, %v378_v52 }

</bundles_post_ra>
